<compile_context>
chip_gen: v7x
topology: tpu7x:2x2x1
jax: 0.10.0
libtpu: 0.0.40
codegen_flags: <defaults>
</compile_context>

<pallas_src>
import jax
import jax.numpy as jnp
from jax.experimental import pallas as pl
from jax.experimental.pallas import tpu as pltpu


# ---------------------------------------------------------------------------
# Kernels
# ---------------------------------------------------------------------------

def _conv1x1_small_kernel(x_ref, wt_ref, b_ref, o_ref):
    # x_ref : (M, Cin)      activations, one row per (batch, pixel)
    # wt_ref: (Cin, Cout)   pre-transposed weights
    # b_ref : (1, Cout)     bias (broadcast over rows)
    # o_ref : (M, Cout)     lane-dense output (Cout on the lane axis)
    acc = jnp.dot(
        x_ref[...].astype(jnp.bfloat16),
        wt_ref[...].astype(jnp.bfloat16),
        preferred_element_type=jnp.float32,
    )
    o_ref[...] = (acc + b_ref[...]).astype(o_ref.dtype)


def _conv1x1_tiled_kernel(x_ref, w_ref, b_ref, o_ref):
    # x_ref: (Cin, TM)   activation tile (channels on sublanes, spatial on lanes)
    # w_ref: (Cout, Cin) weights (constant index_map -> VMEM resident)
    # b_ref: (Cout, 1)   bias    (resident)
    # o_ref: (Cout, TM)  lane-dense output tile
    acc = jnp.dot(
        w_ref[...].astype(jnp.bfloat16),
        x_ref[...].astype(jnp.bfloat16),
        preferred_element_type=jnp.float32,
    )
    o_ref[...] = (acc + b_ref[...]).astype(o_ref.dtype)


# ---------------------------------------------------------------------------
# Tiling helpers
# ---------------------------------------------------------------------------

def _default_max_tm() -> int:
    """Generation-aware spatial tile cap (stays inside default scoped VMEM)."""
    try:
        kind = jax.devices()[0].device_kind.lower()
    except Exception:
        return 2048
    if ("v6" in kind) or ("v7" in kind):
        # 32 MiB default scoped VMEM: tm=4096 -> ~20 MiB double-buffered, fits.
        return 4096
    # v5e (16 MiB default scoped VMEM) and anything unknown: stay at 2048.
    return 2048


def _pick_spatial_tile(hw: int, n: int, max_tm: int) -> int:
    """Lane-dense (multiple-of-128) tile; prefer >= 2 total grid steps (v7x cores)."""
    if hw <= 128:
        return hw                                        # block == full dim (always legal)
    tm = max(128, min(max_tm, (hw // 128) * 128))
    while tm > 128 and n * pl.cdiv(hw, tm) < 2:
        tm = max(128, ((tm // 2) // 128) * 128)
    return tm


# ---------------------------------------------------------------------------
# Wrapper
# ---------------------------------------------------------------------------

def conv2d_1x1(x_nchw, weight, bias, *, max_tm: int | None = None):
    """1x1 conv, stride 1, with bias (NCHW in / NCHW out).

    x_nchw : (N, Cin, H, W)    float32
    weight : (Cout, Cin, 1, 1) float32
    bias   : (Cout,)           float32
    returns (N, Cout, H, W)    float32
    """
    N, Cin, H, W = x_nchw.shape
    Cout = weight.shape[0]
    HW = H * W
    w_mat = weight.reshape(Cout, Cin)

    # ---- Small-spatial / SE-expand path -----------------------------------
    if HW < 128 and N * HW <= 2048:
        M = N * HW
        if HW == 1:
            x_mat = x_nchw.reshape(N, Cin)               # pure reshape, no transpose
        else:
            # Tiny tensors: the wrapper transpose cost is negligible here.
            x_mat = x_nchw.reshape(N, Cin, HW).transpose(0, 2, 1).reshape(M, Cin)

        out = pl.pallas_call(
            _conv1x1_small_kernel,
            out_shape=jax.ShapeDtypeStruct((M, Cout), x_nchw.dtype),
        )(x_mat, w_mat.T, bias.reshape(1, Cout))

        if HW == 1:
            return out.reshape(N, Cout, 1, 1)
        return out.reshape(N, HW, Cout).transpose(0, 2, 1).reshape(N, Cout, H, W)

    # ---- Large-spatial tiled path ------------------------------------------
    x_mat = x_nchw.reshape(N, Cin, HW)                   # pure reshape
    b_mat = bias.reshape(Cout, 1)

    if max_tm is None:
        max_tm = _default_max_tm()
    tm = _pick_spatial_tile(HW, N, max_tm)
    n_tiles = pl.cdiv(HW, tm)

    # Advisory cost hint: HBM-bandwidth bound (K = Cin = 24, Cout/Cin = 24x).
    cost = pl.CostEstimate(
        flops=2 * N * HW * Cin * Cout,
        transcendentals=0,
        bytes_accessed=4 * (N * HW * Cin + Cin * Cout + Cout + N * HW * Cout),
    )

    out = pl.pallas_call(
        _conv1x1_tiled_kernel,
        out_shape=jax.ShapeDtypeStruct((N, Cout, HW), x_nchw.dtype),
        grid_spec=pltpu.PrefetchScalarGridSpec(
            num_scalar_prefetch=0,
            grid=(N, n_tiles),
            in_specs=[
                # Activation: stream spatial tiles (batch dim squeezed out).
                pl.BlockSpec((None, Cin, tm), lambda n, i: (n, 0, i)),
                # Weights / bias: constant index_map -> stay resident in VMEM.
                pl.BlockSpec((Cout, Cin), lambda n, i: (0, 0)),
                pl.BlockSpec((Cout, 1), lambda n, i: (0, 0)),
            ],
            out_specs=pl.BlockSpec((None, Cout, tm), lambda n, i: (n, 0, i)),
        ),
        compiler_params=pltpu.CompilerParams(
            dimension_semantics=("parallel", "parallel"),
        ),
        cost_estimate=cost,
    )(x_mat, w_mat, b_mat)

    return out.reshape(N, Cout, H, W)


# ---------------------------------------------------------------------------
# Self-test
# ---------------------------------------------------------------------------

if __name__ == "__main__":
    key = jax.random.PRNGKey(0)
    k_x, k_w, k_b = jax.random.split(key, 3)

    Cin, Cout = 24, 576
    weight = jax.random.normal(k_w, (Cout, Cin, 1, 1), dtype=jnp.float32) * (1.0 / Cin) ** 0.5
    bias = jax.random.normal(k_b, (Cout,), dtype=jnp.float32) * 0.01

    def reference(x):
        return (jnp.einsum("nchw,oc->nohw", x, weight.reshape(Cout, Cin))
                + bias.reshape(1, Cout, 1, 1))

    # bf16 MXU operands (f32 accumulation, K=24) -> relaxed tolerance vs f32 ref.
    tol = dict(atol=5e-2, rtol=1e-2)

    # 1) The module's real shape: SE-expand (1, 24, 1, 1) -> lane-dense small path.
    x1 = jax.random.normal(k_x, (1, Cin, 1, 1), dtype=jnp.float32)
    o1 = jax.block_until_ready(conv2d_1x1(x1, weight, bias))
    assert o1.shape == (1, Cout, 1, 1)
    assert jnp.allclose(o1, reference(x1), **tol)

    # 2) Small spatial (HW < 128), batch > 1 -> small path with cheap transpose.
    x2 = jax.random.normal(k_x, (2, Cin, 4, 4), dtype=jnp.float32)
    o2 = jax.block_until_ready(conv2d_1x1(x2, weight, bias))
    assert o2.shape == (2, Cout, 4, 4)
    assert jnp.allclose(o2, reference(x2), **tol)

    # 3) Large spatial (HW = 256 >= 128) -> tiled, resident-weight path.
    x3 = jax.random.normal(k_x, (2, Cin, 16, 16), dtype=jnp.float32)
    o3 = jax.block_until_ready(conv2d_1x1(x3, weight, bias))
    assert o3.shape == (2, Cout, 16, 16)
    assert jnp.allclose(o3, reference(x3), **tol)

    print("KERNEL_OK")
</pallas_src>

<mosaic_0001>
module attributes {stable_mosaic.version = 11 : i64} {
  func.func @_conv1x1_small_kernel(%arg0: memref<1x24xf32, #tpu.memory_space<vmem>>, %arg1: memref<24x576xf32, #tpu.memory_space<vmem>>, %arg2: memref<1x576xf32, #tpu.memory_space<vmem>>, %arg3: memref<1x576xf32, #tpu.memory_space<vmem>>) attributes {dimension_semantics = [], scalar_prefetch = 0 : i64, scratch_operands = 0 : i64, tpu.core_type = #tpu.core_type<tc>} {
    %c0 = arith.constant 0 : index
    %c0_0 = arith.constant 0 : index
    %0 = vector.load %arg0[%c0, %c0_0] : memref<1x24xf32, #tpu.memory_space<vmem>>, vector<1x24xf32>
    %1 = arith.truncf %0 : vector<1x24xf32> to vector<1x24xbf16>
    %c0_1 = arith.constant 0 : index
    %c0_2 = arith.constant 0 : index
    %2 = vector.load %arg1[%c0_1, %c0_2] : memref<24x576xf32, #tpu.memory_space<vmem>>, vector<24x576xf32>
    %3 = arith.truncf %2 : vector<24x576xf32> to vector<24x576xbf16>
    %cst = arith.constant dense<0.000000e+00> : vector<1x576xf32>
    %4 = tpu.matmul %1, %3, %cst {dimension_numbers = #tpu.dot_dimension_numbers<[1], [0], [0], [1], [0, 0, 1, 1], [], []>} : vector<1x24xbf16>, vector<24x576xbf16>, vector<1x576xf32> -> vector<1x576xf32>
    %c0_3 = arith.constant 0 : index
    %c0_4 = arith.constant 0 : index
    %5 = vector.load %arg2[%c0_3, %c0_4] : memref<1x576xf32, #tpu.memory_space<vmem>>, vector<1x576xf32>
    %6 = arith.addf %4, %5 : vector<1x576xf32>
    %c0_5 = arith.constant 0 : index
    %c0_6 = arith.constant 0 : index
    %7 = vector.load %arg3[%c0_5, %c0_6] : memref<1x576xf32, #tpu.memory_space<vmem>>, vector<1x576xf32>
    tpu.vector_store %arg3[%c0_5, %c0_6], %6 {strides = array<i32>} : memref<1x576xf32, #tpu.memory_space<vmem>>, vector<1x576xf32>,
    return
  }
}

</mosaic_0001>

<bundles_post_ra>
// kernel: tpu_custom_call.1
= control target key start
LH: loop header
LB: loop body
LE: loop exit
PB: predicated region body
PF: predicated region fallthrough
CT: control target
= control target key end

     0   :  { %8 = vsyncpa [#allocation3], 0  ;;  %s481_s0 = inlined_call_operand.hbm [shape: f32[1,24], index: 0, kind: input, shape index: {}]   ;;  %s482_s1 = inlined_call_operand.hbm [shape: f32[24,576], index: 1, kind: input, shape index: {}]   ;;  %s483_s2 = inlined_call_operand.vmem [shape: f32[1,576], index: 2, kind: input, shape index: {}]   ;;  %s484_s3 = inlined_call_operand.hbm [shape: f32[1,576], index: 3, kind: output, shape index: {}]  }
   0x1   :  { %9 = vsyncpa [#allocation6], 0 }
   0x2   :  { %10 = vsyncpa [#allocation4], 0  ;;  %s401_s12 = smov [#allocation2]   ;;  %s402_s14 = smov [#allocation5]  }
   0x3   :  { %s17_s13 = sshll.u32 %s401_s12, 4  ;;  %s26_s15 = sshll.u32 %s402_s14, 4  ;;  %s18_s13 = int_to_ptr.vmem [resolvable:$true] %s17_s13  ;;  %s430_s15 = int_to_ptr.vmem [resolvable:$true] %s26_s15 }
   0x4   :  { %s329_s18 = scalar_lea.hbm %s481_s0, 16 }
   0x5   :  { %p330_p0 = scmp.ne.s32.totalorder %s481_s0, %s329_s18  ;;  %p333_p1 = scmp.lt.u32.totalorder %s329_s18, %s481_s0 }
   0x7   :  { %p335_p2 = pnand %p333_p1, %p330_p0 }
   0x9   :  { %338 = shalt.err (!%p335_p2)
}
   0xa   :  { %s339_s23 = scalar_lea.vmem %s18_s13, 16  ;;  %s343_s24 = scalar_lea.vmem %s18_s13, 32 }
   0xb   :  { %p340_p3 = scmp.ne.s32.totalorder %s18_s13, %s339_s23  ;;  %p344_p4 = scmp.lt.s32.totalorder %s18_s13, %s18_s13 }
   0xc   :  { %p345_p5 = scmp.lt.s32.totalorder %s343_s24, %s339_s23 }
   0xe   :  { %p346_p6 = por %p345_p5, %p344_p4 }
  0x10   :  { %p347_p7 = pnand %p346_p6, %p340_p3 }
  0x12   :  { %350 = shalt.err (!%p347_p7)
}
  0x13   :  { %20 = dma.hbm_to_vmem [thread:$0]  %s481_s0, 16, %s18_s13, [#allocation3]  }
  0x14   :  { %s351_s29 = scalar_lea.hbm %s482_s1, 1920 }
  0x15   :  { %p352_p8 = scmp.ne.s32.totalorder %s482_s1, %s351_s29  ;;  %p355_p9 = scmp.lt.u32.totalorder %s351_s29, %s482_s1 }
  0x17   :  { %p357_p10 = pnand %p355_p9, %p352_p8 }
  0x19   :  { %360 = shalt.err (!%p357_p10)
}
  0x1a   :  { %s361_s7 = scalar_lea.vmem %s430_s15, 1920  ;;  %p366_p12 = scmp.lt.s32.totalorder %s430_s15, %s430_s15 }
  0x1b   :  { %p362_p11 = scmp.ne.s32.totalorder %s430_s15, %s361_s7  ;;  %p367_p13 = scmp.lt.s32.totalorder %s361_s7, %s361_s7 }
  0x1d   :  { %p368_p0 = por %p367_p13, %p366_p12 }
  0x1f   :  { %p369_p1 = pnand %p368_p0, %p362_p11 }
  0x21   :  { %372 = shalt.err (!%p369_p1)
}
  0x22   :  { %s403_s0 = smov 640   ;;  %s404_s8 = smov 40  }
  0x23   :  { %32 = dma.hbm_to_vmem [thread:$0]  %s482_s1, 1920, %s430_s15, [#allocation6], %s403_s0, %s403_s0, %s404_s8  }
  0x24   :  { %395 = dma.done.wait [#allocation3], 16  }
  0x25   :  { %396 = vsyncadd [#allocation3], 4294967280 }
  0x26   :  { %397 = dma.done.wait [#allocation6], 1920  }
  0x27   :  { %398 = vsyncadd [#allocation6], 4294965376  ;;  %v405_v0 = vmov 0   ;;  %v45_v1 = vld [vmem:[#allocation5 + $0x8] sm:$0xff]  ;;  %v50_v2 = vld [vmem:[#allocation5 + $0x30] sm:$0xff]  ;;  %vm100_vm0 = vcmask 1043456   ;;  %v71_v32 = vlaneseq }
  0x28   :  { %148 = vmatprep.mubr.bf16.mxu0 %v405_v0  ;;  %189 = vmatprep.mubr.bf16.mxu1 %v405_v0  ;;  %v47_v3 = vld [vmem:[#allocation5 + $0x18] sm:$0xff]  ;;  %v60_v4 = vpack.c.bf16 %v50_v2, %v45_v1  ;;  %v52_v5 = vld [vmem:[#allocation5 + $0x40] sm:$0xff]  ;;  %v49_v7 = vld [vmem:[#allocation5 + $0x28] sm:$0xff]  ;;  %vm96_vm1 = vcmask 195584   ;;  %v406_v29 = vmov 0.0   ;;  %vm407_vm2 = vmmov 0  }
  0x29   :  { %v44_v6 = vld [vmem:[#allocation5] sm:$0xff]  ;;  %v62_v8 = vpack.c.bf16 %v52_v5, %v47_v3  ;;  %v46_v10 = vld [vmem:[#allocation5 + $0x10] sm:$0xff]  ;;  %v51_v11 = vld [vmem:[#allocation5 + $0x38] sm:$0xff]  ;;  %v72_v33 = vshrl.u32 %v71_v32, 7  ;;  %v408_v38 = vmov 1966171168  }
  0x2a   :  { %v59_v9 = vpack.c.bf16 %v49_v7, %v44_v6  ;;  %v55_v12 = vld [vmem:[#allocation5 + $0x58] sm:$0xff]  ;;  %116 = vmatprep.subr.bf16.mxu0 %v60_v4  ;;  %v61_v13 = vpack.c.bf16 %v51_v11, %v46_v10  ;;  %v57_v15 = vld [vmem:[#allocation5 + $0x68] sm:$0xff]  ;;  %v54_v16 = vld [vmem:[#allocation5 + $0x50] sm:$0xff]  ;;  %v246_v39 = vunpack.c.l.s4 %v408_v38  ;;  %vm285_vm3 = vcmp.lt.s32.totalorder %v71_v32, 576 }
  0x2b   :  { %v65_v14 = vpack.c.bf16 %v55_v12, %v55_v12  ;;  %v56_v17 = vld [vmem:[#allocation5 + $0x60] sm:$0xff]  ;;  %157 = vmatprep.subr.bf16.mxu1 %v62_v8  ;;  %v67_v18 = vpack.c.bf16 %v57_v15, %v57_v15  ;;  %v64_v19 = vpack.c.bf16 %v54_v16, %v54_v16  ;;  %v42_v21 = vld [vmem:[#allocation2] sm:$0x1]  ;;  %v53_v23 = vld [vmem:[#allocation5 + $0x48] sm:$0xff]  ;;  %v73_v34 = vsub.s32 0, %v72_v33 }
  0x2c   :  { %117 = vmatpush1.bf16.msra.mxu0 %v59_v9  ;;  %v66_v20 = vpack.c.bf16 %v56_v17, %v56_v17  ;;  %158 = vmatpush1.bf16.msra.mxu1 %v61_v13  ;;  %v48_v22 = vld [vmem:[#allocation5 + $0x20] sm:$0xff]  ;;  %v58_v26 = vld [vmem:[#allocation5 + $0x70] sm:$0xff]  ;;  %v43_v27 = vpack.c.bf16 %v42_v21, %v42_v21  ;;  %v81_v36 = vsub.s32 2, %v72_v33  ;;  %v77_v37 = vsub.s32 1, %v72_v33 }
  0x2d   :  { %304 = vmatprep.subr.msk.bf16.mxu0 %vm100_vm0, %v65_v14  ;;  %306 = vmatprep.subr.msk.bf16.mxu1 %vm100_vm0, %v67_v18  ;;  %v102_v24 = vsel %vm100_vm0, %v64_v19, 0  ;;  %v63_v28 = vpack.c.bf16 %v53_v23, %v48_v22  ;;  %v68_v30 = vpack.c.bf16 %v58_v26, %v58_v26  ;;  %v69_v35 = vld [vmem:[%s483_s2] sm:$0x1f]  ;;  %v85_v40 = vsub.s32 3, %v72_v33  ;;  %s409_s2 = smov [#allocation7]  }
  0x2e   :  { %v108_v25 = vsel %vm100_vm0, %v66_v20, 0  ;;  %v74_v41 = vrot.slane %v69_v35, %v73_v34  ;;  %v82_v42 = vrot.slane %v69_v35, %v81_v36  ;;  %v78_v43 = vrot.slane %v69_v35, %v77_v37  ;;  %s294_s12 = sshll.u32 %s409_s2, 4  ;;  %s295_s12 = int_to_ptr.vmem [resolvable:$true] %s294_s12 }
  0x2f   :  { %v114_v31 = vsel %vm100_vm0, %v68_v30, 0  ;;  %v247_v44 = vunpack.c.0.s8 %v246_v39  ;;  %v86_v45 = vrot.slane %v69_v35, %v85_v40  ;;  %v89_v50 = vsub.s32 4, %v72_v33  ;;  %s373_s13 = scalar_lea.vmem %s295_s12, 80  ;;  %s377_s14 = scalar_lea.vmem %s295_s12, 96 }
  0x30   :  { %119 = vmatpush1.bf16.msra.mxu0 %v102_v24  ;;  %160 = vmatpush1.bf16.msra.mxu1 %v108_v25  ;;  %p374_p2 = scmp.ne.s32.totalorder %s295_s12, %s373_s13  ;;  %p378_p3 = scmp.lt.s32.totalorder %s295_s12, %s295_s12 }
  0x31   :  { %312 = vmatprep.subr.bf16.mxu0 %v406_v29  ;;  %v250_v53 = vsub.s32 %v247_v44, %v72_v33  ;;  %v90_v62 = vrot.slane %v69_v35, %v89_v50  ;;  %p379_p4 = scmp.lt.s32.totalorder %s377_s14, %s373_s13 }
  0x33   :  { %305 = vmatmul.mubr.msk.bf16.vlgmr.msra.gmra.mrb[0].mxu0 %vm96_vm1, %v43_v27  ;;  %307 = vmatmul.mubr.msk.bf16.vlgmr.msra.gmra.mrb[0].mxu1 %vm96_vm1, %v43_v27  ;;  %p380_p5 = por %p379_p4, %p378_p3 }
  0x34   :  { %313 = vmatpush3.bf16.msra.mxu0 %v63_v28  ;;  %316 = vmatprep.mubr.msk.bf16.mxu0 %vm407_vm2, %v406_v29 }
  0x35   :  { %314 = vmatprep.subr.bf16.mxu0 %v406_v29  ;;  %p381_p6 = pnand %p380_p5, %p374_p2 }
  0x38   :  { %315 = vmatpush3.bf16.msra.mxu0 %v114_v31 }
  0x3b   :  { %317 = vmatmul.mubr.msk.bf16.vlgmr.msra.gmra.mrb[4].mxu0 %vm96_vm1, %v43_v27 }
 0x106   :  { %v150_v46 = vpop.f32.mrb[0].mxu0  ;;  %v191_v48 = vpop.f32.mrb[0].mxu1 }
 0x107   :  { %v151_v47 = vadd.f32 %v150_v46, %v74_v41  ;;  %v152_v49 = vpop.f32.mrb[1].mxu0  ;;  %v192_v51 = vadd.f32 %v191_v48, %v82_v42  ;;  %v193_v54 = vpop.f32.mrb[1].mxu1 }
 0x108   :  { %v153_v52 = vadd.f32 %v152_v49, %v78_v43  ;;  %v154_v55 = vpop.f32.mrb[2].mxu0  ;;  %v194_v56 = vadd.f32 %v193_v54, %v86_v45  ;;  %v195_v58 = vpop.f32.mrb[2].mxu1 }
 0x109   :  { %v155_v57 = vpop.f32.mrb[3].mxu0  ;;  %v196_v60 = vpop.f32.mrb[3].mxu1 }
 0x10a   :  { %v243_v59 = vcombine.low %v151_v47, %v153_v52  ;;  %v244_v61 = vcombine.low %v192_v51, %v194_v56 }
 0x10c   :  { %v251_v63 = vrot.slane %v243_v59, %v250_v53  ;;  %v258_v0 = vrot.slane %v244_v61, %v250_v53 }
 0x10e   :  { %v232_v1 = vpop.f32.mrb[4].mxu0  ;;  %v266_v2 = vcombine.low %v251_v63, %v258_v0 }
 0x10f   :  { %v233_v3 = vadd.f32 %v232_v1, %v90_v62  ;;  %v318_v4 = vpop.f32.mrb[5].mxu0 }
 0x110   :  { %v235_v5 = vpop.f32.mrb[6].mxu0  ;;  %v273_v9 = vrot.slane %v266_v2, %v250_v53 }
 0x111   :  { %v265_v6 = vrot.slane %v233_v3, %v250_v53  ;;  %v319_v7 = vpop.f32.mrb[7].mxu0 }
 0x113   :  { %v280_v8 = vrot.slane %v265_v6, %v250_v53 }
 0x115   :  { %v281_v10 = vcombine.low %v273_v9, %v280_v8 }
 0x117   :  { %287 = vst.msk [vmem:[#allocation7] sm:$0x1f] %vm285_vm3, %v281_v10 }
 0x118   :  { %384 = shalt.err (!%p381_p6)
}
 0x119   :  { %s385_s17 = scalar_lea.hbm %s484_s3, 80 }
 0x11a   :  { %p386_p7 = scmp.ne.s32.totalorder %s484_s3, %s385_s17  ;;  %p389_p8 = scmp.lt.u32.totalorder %s385_s17, %s484_s3 }
 0x11c   :  { %p391_p9 = pnand %p389_p8, %p386_p7 }
 0x11e   :  { %394 = shalt.err (!%p391_p9)
}
 0x11f   :  { %297 = dma.vmem_to_hbm [thread:$0]  %s295_s12, 80, %s484_s3, [#allocation4]  }
 0x120   :  { %399 = dma.done.wait [#allocation4], 80  }
 0x121   :  { %400 = vsyncadd [#allocation4], 4294967216 }
 0x122   :  { %301 = vsyncpa [#allocation3], 1 }
 0x123   :  { %302 = vsyncpa [#allocation6], 1 }
 0x124   :  { %303 = vsyncpa [#allocation4], 1 }

</bundles_post_ra>
